<compile_context>
chip_gen: v7x
topology: tpu7x:2x2x1
jax: 0.10.0
libtpu: 0.0.40
codegen_flags: <defaults>
</compile_context>

<pallas_src>
import jax
import jax.numpy as jnp
from jax.experimental import pallas as pl
from jax.experimental.pallas import tpu as pltpu

LANES = 128


def fused_conv_relu_pool_fc_kernel(x_ref, wexp_ref, wfexp_ref, bias_ref, out_ref):
    # x_ref:     [TILE_N, Hp*Wp] bf16  flattened circularly-padded images
    # wexp_ref:  [Hp*Wp, 128]    bf16  expanded conv weight (cols s*H+c; zero padded)
    # wfexp_ref: [128, 128]      bf16  (fc_w.T tiled over S windows) / S, zero padded
    # bias_ref:  [2, 128]        f32   row 0: conv bias tiled per window, row 1: fc bias
    # out_ref:   [TILE_N, 128]   f32   logits in cols 0..9, zeros elsewhere
    conv = jnp.dot(x_ref[...], wexp_ref[...],
                   preferred_element_type=jnp.float32)           # [TILE_N, S*H] (padded)
    act = jnp.maximum(conv + bias_ref[0:1, :], 0.0)              # conv bias + ReLU (VPU)
    out = jnp.dot(act.astype(wfexp_ref.dtype), wfexp_ref[...],
                  preferred_element_type=jnp.float32)            # pool + linear, fused
    out_ref[...] = out + bias_ref[1:2, :]


def simple_conv_test_forward(x, conv_w, conv_b, fc_w, fc_b, padding=1, tile_n=1024):
    """x: [N, 1, Hin, Win] (NCHW, PyTorch layout). Returns [N, 10]."""
    N, C, Hin, Win = x.shape
    OC, IC, KH, KW = conv_w.shape
    assert C == IC == 1
    n_classes = fc_w.shape[0]

    Hp, Wp = Hin + 2 * padding, Win + 2 * padding
    OH, OW = Hp - KH + 1, Wp - KW + 1
    S = OH * OW
    P = Hp * Wp
    assert S * OC <= LANES and n_classes <= LANES

    # ---- host-side prep (cheap, O(N*P) + tiny weight transforms) ----------------
    # circular padding (PyTorch padding_mode='circular' == numpy 'wrap')
    xp = jnp.pad(x, ((0, 0), (0, 0), (padding, padding), (padding, padding)),
                 mode="wrap")
    x_flat = xp.reshape(N, P).astype(jnp.bfloat16)

    # expanded conv weight: one matmul computes all S output positions at once
    w_hw_c = jnp.transpose(conv_w[:, 0, :, :], (1, 2, 0)).astype(jnp.float32)  # [KH,KW,OC]
    cols = []
    for oh in range(OH):
        for ow in range(OW):
            buf = jnp.zeros((Hp, Wp, OC), jnp.float32)
            buf = buf.at[oh:oh + KH, ow:ow + KW, :].set(w_hw_c)
            cols.append(buf.reshape(P, OC))
    wexp = jnp.concatenate(cols, axis=1)                                        # [P, S*OC]
    wexp = jnp.pad(wexp, ((0, 0), (0, LANES - S * OC))).astype(jnp.bfloat16)

    # mean-pool over the S windows folded into the classifier weight (1/S baked in)
    wfexp = jnp.tile(fc_w.T.astype(jnp.float32) / S, (S, 1))                    # [S*OC, 10]
    wfexp = jnp.pad(wfexp, ((0, LANES - S * OC),
                            (0, LANES - n_classes))).astype(jnp.bfloat16)

    biases = jnp.stack([
        jnp.pad(jnp.tile(conv_b.astype(jnp.float32), S), (0, LANES - S * OC)),
        jnp.pad(fc_b.astype(jnp.float32), (0, LANES - n_classes)),
    ])                                                                          # [2, 128]

    # ---- batch tiling -------------------------------------------------------------
    if N <= tile_n:
        tile_n = N           # single tile; block == full dim is always legal
        n_pad = N
    else:
        n_pad = pl.cdiv(N, tile_n) * tile_n
        if n_pad != N:
            x_flat = jnp.pad(x_flat, ((0, n_pad - N), (0, 0)))
    grid = (n_pad // tile_n,)

    out = pl.pallas_call(
        fused_conv_relu_pool_fc_kernel,
        out_shape=jax.ShapeDtypeStruct((n_pad, LANES), jnp.float32),
        grid=grid,
        in_specs=[
            pl.BlockSpec((tile_n, P), lambda i: (i, 0)),        # batch-tiled input
            pl.BlockSpec((P, LANES), lambda i: (0, 0)),         # grid-invariant weights
            pl.BlockSpec((LANES, LANES), lambda i: (0, 0)),
            pl.BlockSpec((2, LANES), lambda i: (0, 0)),
        ],
        out_specs=pl.BlockSpec((tile_n, LANES), lambda i: (i, 0)),
        compiler_params=pltpu.CompilerParams(
            dimension_semantics=("parallel",)),
    )(x_flat, wexp, wfexp, biases)

    return out[:N, :n_classes].astype(x.dtype)


def reference_forward(x, conv_w, conv_b, fc_w, fc_b, padding=1):
    """Pure-JAX f32 reference of the PyTorch module."""
    xp = jnp.pad(x, ((0, 0), (0, 0), (padding, padding), (padding, padding)),
                 mode="wrap")
    conv = jax.lax.conv_general_dilated(
        xp, conv_w, window_strides=(1, 1), padding="VALID",
        dimension_numbers=("NCHW", "OIHW", "NCHW"))
    conv = conv + conv_b[None, :, None, None]
    act = jnp.maximum(conv, 0.0)
    pooled = jnp.mean(act, axis=(2, 3))          # AdaptiveAvgPool2d(1) + flatten
    return pooled @ fc_w.T + fc_b


if __name__ == "__main__":
    n_hidden = 8
    kernel_size = 28
    padding_size = 1
    N, Hin, Win = 2, 28, 28                      # MNIST-like input, 1 channel

    key = jax.random.PRNGKey(0)
    k_x, k_cw, k_cb, k_fw, k_fb = jax.random.split(key, 5)

    x = jax.random.normal(k_x, (N, 1, Hin, Win), dtype=jnp.float32)
    conv_w = jax.random.normal(k_cw, (n_hidden, 1, kernel_size, kernel_size),
                               dtype=jnp.float32) * 0.05
    conv_b = jax.random.normal(k_cb, (n_hidden,), dtype=jnp.float32) * 0.05
    fc_w = jax.random.normal(k_fw, (10, n_hidden), dtype=jnp.float32) * 0.1
    fc_b = jax.random.normal(k_fb, (10,), dtype=jnp.float32) * 0.1

    out = simple_conv_test_forward(x, conv_w, conv_b, fc_w, fc_b,
                                   padding=padding_size)
    out = jax.block_until_ready(out)
    ref = reference_forward(x, conv_w, conv_b, fc_w, fc_b, padding=padding_size)
    assert out.shape == (N, 10)
    assert jnp.allclose(out, ref, rtol=1e-2, atol=1e-2), (out, ref)

    # also exercise the multi-tile grid + batch-padding path
    N2 = 19
    x2 = jax.random.normal(jax.random.PRNGKey(1), (N2, 1, Hin, Win), jnp.float32)
    out2 = simple_conv_test_forward(x2, conv_w, conv_b, fc_w, fc_b,
                                    padding=padding_size, tile_n=8)
    out2 = jax.block_until_ready(out2)
    ref2 = reference_forward(x2, conv_w, conv_b, fc_w, fc_b, padding=padding_size)
    assert out2.shape == (N2, 10)
    assert jnp.allclose(out2, ref2, rtol=1e-2, atol=1e-2), (out2, ref2)

    print("KERNEL_OK")
</pallas_src>

<mosaic_0001>
module attributes {stable_mosaic.version = 11 : i64} {
  func.func @fused_conv_relu_pool_fc_kernel(%arg0: i32, %arg1: memref<2x900xbf16, #tpu.memory_space<vmem>>, %arg2: memref<900x128xbf16, #tpu.memory_space<vmem>>, %arg3: memref<128x128xbf16, #tpu.memory_space<vmem>>, %arg4: memref<2x128xf32, #tpu.memory_space<vmem>>, %arg5: memref<2x128xf32, #tpu.memory_space<vmem>>) attributes {dimension_semantics = [#tpu.dimension_semantics<parallel>], iteration_bounds = array<i64: 1>, scalar_prefetch = 0 : i64, scratch_operands = 0 : i64, tpu.core_type = #tpu.core_type<tc>, window_params = [{transform_indices = @transform_0, window_bounds = array<i64: 2, 900>}, {pipeline_mode = #tpu.pipeline_mode<synchronous>, transform_indices = @transform_1, window_bounds = array<i64: 900, 128>}, {pipeline_mode = #tpu.pipeline_mode<synchronous>, transform_indices = @transform_2, window_bounds = array<i64: 128, 128>}, {pipeline_mode = #tpu.pipeline_mode<synchronous>, transform_indices = @transform_3, window_bounds = array<i64: 2, 128>}, {transform_indices = @transform_4, window_bounds = array<i64: 2, 128>}]} {
    %c0 = arith.constant 0 : index
    %c0_0 = arith.constant 0 : index
    %0 = vector.load %arg1[%c0, %c0_0] : memref<2x900xbf16, #tpu.memory_space<vmem>>, vector<2x900xbf16>
    %c0_1 = arith.constant 0 : index
    %c0_2 = arith.constant 0 : index
    %1 = vector.load %arg2[%c0_1, %c0_2] : memref<900x128xbf16, #tpu.memory_space<vmem>>, vector<900x128xbf16>
    %cst = arith.constant dense<0.000000e+00> : vector<2x128xf32>
    %2 = tpu.matmul %0, %1, %cst {dimension_numbers = #tpu.dot_dimension_numbers<[1], [0], [0], [1], [0, 0, 1, 1], [], []>} : vector<2x900xbf16>, vector<900x128xbf16>, vector<2x128xf32> -> vector<2x128xf32>
    %c0_3 = arith.constant 0 : index
    %c0_4 = arith.constant 0 : index
    %3 = vector.load %arg4[%c0_3, %c0_4] : memref<2x128xf32, #tpu.memory_space<vmem>>, vector<1x128xf32>
    %4 = vector.broadcast %3 : vector<1x128xf32> to vector<2x128xf32>
    %5 = arith.addf %2, %4 : vector<2x128xf32>
    %cst_5 = arith.constant 0.000000e+00 : f32
    %6 = vector.broadcast %cst_5 : f32 to vector<2x128xf32>
    %7 = arith.maximumf %5, %6 : vector<2x128xf32>
    %8 = arith.truncf %7 : vector<2x128xf32> to vector<2x128xbf16>
    %c0_6 = arith.constant 0 : index
    %c0_7 = arith.constant 0 : index
    %9 = vector.load %arg3[%c0_6, %c0_7] : memref<128x128xbf16, #tpu.memory_space<vmem>>, vector<128x128xbf16>
    %cst_8 = arith.constant dense<0.000000e+00> : vector<2x128xf32>
    %10 = tpu.matmul %8, %9, %cst_8 {dimension_numbers = #tpu.dot_dimension_numbers<[1], [0], [0], [1], [0, 0, 1, 1], [], []>} : vector<2x128xbf16>, vector<128x128xbf16>, vector<2x128xf32> -> vector<2x128xf32>
    %c1 = arith.constant 1 : index
    %c0_9 = arith.constant 0 : index
    %11 = vector.load %arg4[%c1, %c0_9] : memref<2x128xf32, #tpu.memory_space<vmem>>, vector<1x128xf32>
    %12 = vector.broadcast %11 : vector<1x128xf32> to vector<2x128xf32>
    %13 = arith.addf %10, %12 : vector<2x128xf32>
    %c0_10 = arith.constant 0 : index
    %c0_11 = arith.constant 0 : index
    %14 = vector.load %arg5[%c0_10, %c0_11] : memref<2x128xf32, #tpu.memory_space<vmem>>, vector<2x128xf32>
    tpu.vector_store %arg5[%c0_10, %c0_11], %13 {strides = array<i32>} : memref<2x128xf32, #tpu.memory_space<vmem>>, vector<2x128xf32>,
    return
  }
  func.func @transform_0(%arg0: i32) -> (i32, i32) {
    %c0_i32 = arith.constant 0 : i32
    %c0_i32_0 = arith.constant 0 : i32
    return %arg0, %c0_i32 : i32, i32
  }
  func.func @transform_1(%arg0: i32) -> (i32, i32) {
    %c0_i32 = arith.constant 0 : i32
    %c0_i32_0 = arith.constant 0 : i32
    %c0_i32_1 = arith.constant 0 : i32
    return %c0_i32, %c0_i32_0 : i32, i32
  }
  func.func @transform_2(%arg0: i32) -> (i32, i32) {
    %c0_i32 = arith.constant 0 : i32
    %c0_i32_0 = arith.constant 0 : i32
    %c0_i32_1 = arith.constant 0 : i32
    return %c0_i32, %c0_i32_0 : i32, i32
  }
  func.func @transform_3(%arg0: i32) -> (i32, i32) {
    %c0_i32 = arith.constant 0 : i32
    %c0_i32_0 = arith.constant 0 : i32
    %c0_i32_1 = arith.constant 0 : i32
    return %c0_i32, %c0_i32_0 : i32, i32
  }
  func.func @transform_4(%arg0: i32) -> (i32, i32) {
    %c0_i32 = arith.constant 0 : i32
    %c0_i32_0 = arith.constant 0 : i32
    return %arg0, %c0_i32 : i32, i32
  }
}

</mosaic_0001>

<bundles_post_ra>
// kernel: tpu_custom_call.1
= control target key start
LH: loop header
LB: loop body
LE: loop exit
PB: predicated region body
PF: predicated region fallthrough
CT: control target
= control target key end

     0   :  { %9 = vsyncpa [#allocation3], 0  ;;  %s1319_s0 = inlined_call_operand.hbm [shape: bf16[2,900], index: 0, kind: input, shape index: {}]   ;;  %s1320_s1 = inlined_call_operand.hbm [shape: bf16[900,128], index: 1, kind: input, shape index: {}]   ;;  %s1321_s2 = inlined_call_operand.hbm [shape: bf16[128,128], index: 2, kind: input, shape index: {}]   ;;  %s1322_s3 = inlined_call_operand.vmem [shape: f32[2,128], index: 3, kind: input, shape index: {}]   ;;  %s1323_s4 = inlined_call_operand.hbm [shape: f32[2,128], index: 4, kind: output, shape index: {}]  }
   0x1   :  { %10 = vsyncpa [#allocation6], 0 }
   0x2   :  { %11 = vsyncpa [#allocation4], 0  ;;  %s1202_s15 = smov [#allocation5]   ;;  %s1108_s19 = scalar_lea.hbm %s1320_s1, 7232 }
   0x3   :  { %s27_s16 = sshll.u32 %s1202_s15, 4  ;;  %p1109_p0 = scmp.ne.s32.totalorder %s1320_s1, %s1108_s19  ;;  %s28_s16 = int_to_ptr.vmem [resolvable:$true] %s27_s16 }
   0x4   :  { %p1112_p1 = scmp.lt.u32.totalorder %s1108_s19, %s1320_s1 }
   0x6   :  { %p1114_p2 = pnand %p1112_p1, %p1109_p0 }
   0x8   :  { %1117 = shalt.err (!%p1114_p2)
}
   0x9   :  { %s1118_s24 = scalar_lea.vmem %s28_s16, 7232  ;;  %p1123_p4 = scmp.lt.s32.totalorder %s28_s16, %s28_s16 }
   0xa   :  { %p1119_p3 = scmp.ne.s32.totalorder %s28_s16, %s1118_s24  ;;  %p1124_p5 = scmp.lt.s32.totalorder %s1118_s24, %s1118_s24 }
   0xc   :  { %p1125_p6 = por %p1124_p5, %p1123_p4 }
   0xe   :  { %p1126_p7 = pnand %p1125_p6, %p1119_p3 }
  0x10   :  { %1129 = shalt.err (!%p1126_p7)
}
  0x11   :  { %s1203_s25 = smov 64   ;;  %s1204_s26 = smov 4  }
  0x12   :  { %33 = dma.hbm_to_vmem [thread:$0]  %s1320_s1, 7232, %s28_s16, [#allocation6], %s1203_s25, %s1203_s25, %s1204_s26  }
  0x13   :  { %s1205_s29 = smov [#allocation2]   ;;  %s1206_s5 = smov [#allocation7]  }
  0x14   :  { %s18_s30 = sshll.u32 %s1205_s29, 4  ;;  %s39_s6 = sshll.u32 %s1206_s5, 4  ;;  %s19_s30 = int_to_ptr.vmem [resolvable:$true] %s18_s30  ;;  %s40_s6 = int_to_ptr.vmem [resolvable:$true] %s39_s6 }
  0x15   :  { %s1130_s9 = scalar_lea.hbm %s1319_s0, 128 }
  0x16   :  { %p1131_p8 = scmp.ne.s32.totalorder %s1319_s0, %s1130_s9  ;;  %p1134_p9 = scmp.lt.u32.totalorder %s1130_s9, %s1319_s0 }
  0x18   :  { %p1136_p10 = pnand %p1134_p9, %p1131_p8 }
  0x1a   :  { %1139 = shalt.err (!%p1136_p10)
}
  0x1b   :  { %s1140_s1 = scalar_lea.vmem %s19_s30, 128  ;;  %p1145_p12 = scmp.lt.s32.totalorder %s19_s30, %s19_s30 }
  0x1c   :  { %p1141_p11 = scmp.ne.s32.totalorder %s19_s30, %s1140_s1  ;;  %p1146_p13 = scmp.lt.s32.totalorder %s1140_s1, %s1140_s1 }
  0x1e   :  { %p1147_p0 = por %p1146_p13, %p1145_p12 }
  0x20   :  { %p1148_p1 = pnand %p1147_p0, %p1141_p11 }
  0x22   :  { %1151 = shalt.err (!%p1148_p1)
}
  0x23   :  { %21 = dma.hbm_to_vmem [thread:$0]  %s1319_s0, 128, %s19_s30, [#allocation3]  }
  0x24   :  { %s1152_s18 = scalar_lea.hbm %s1321_s2, 1024 }
  0x25   :  { %p1153_p2 = scmp.ne.s32.totalorder %s1321_s2, %s1152_s18  ;;  %p1156_p3 = scmp.lt.u32.totalorder %s1152_s18, %s1321_s2 }
  0x27   :  { %p1158_p4 = pnand %p1156_p3, %p1153_p2 }
  0x29   :  { %1161 = shalt.err (!%p1158_p4)
}
  0x2a   :  { %s1162_s23 = scalar_lea.vmem %s40_s6, 1024  ;;  %p1167_p6 = scmp.lt.s32.totalorder %s40_s6, %s40_s6 }
  0x2b   :  { %p1163_p5 = scmp.ne.s32.totalorder %s40_s6, %s1162_s23  ;;  %p1168_p7 = scmp.lt.s32.totalorder %s1162_s23, %s1162_s23 }
  0x2d   :  { %p1169_p8 = por %p1168_p7, %p1167_p6 }
  0x2f   :  { %p1170_p9 = pnand %p1169_p8, %p1163_p5 }
  0x31   :  { %1173 = shalt.err (!%p1170_p9)
}
  0x32   :  { %45 = dma.hbm_to_vmem [thread:$0]  %s1321_s2, 1024, %s40_s6, [#allocation6], %s1203_s25, %s1203_s25, %s1204_s26  }
  0x33   :  { %1196 = dma.done.wait [#allocation3], 128  }
  0x34   :  { %1197 = vsyncadd [#allocation3], 4294967168 }
  0x35   :  { %1198 = dma.done.wait [#allocation6], 8256  }
  0x36   :  { %1199 = vsyncadd [#allocation6], 4294959040  ;;  %v1042_v0 = vld [vmem:[#allocation5 + $0x40] sm:$0xff]   ;;  %v1046_v4 = vld [vmem:[#allocation5 + $0x48] sm:$0xff]   ;;  %v1207_v22 = vmov 1966171168   ;;  %v182_v24 = vlaneseq }
  0x37   :  { %v1043_v1 = vld [vmem:[#allocation5 + $0xc0] sm:$0xff]   ;;  %937 = vmatprep.subr.bf16.mxu0 %v1042_v0  ;;  %v1047_v5 = vld [vmem:[#allocation5 + $0xc8] sm:$0xff]   ;;  %v1050_v8 = vld [vmem:[#allocation5 + $0x50] sm:$0xff]   ;;  %v180_v23 = vunpack.c.l.s4 %v1207_v22  ;;  %v1208_v42 = vmov 0   ;;  %vm573_vm0 = vcmask 31744   ;;  %vm577_vm1 = vcmask 1041408  }
  0x38   :  { %v1044_v2 = vld [vmem:[#allocation5] sm:$0xff]   ;;  %959 = vmatprep.subr.bf16.mxu1 %v1043_v1  ;;  %v1048_v6 = vld [vmem:[#allocation5 + $0x8] sm:$0xff]   ;;  %v1051_v9 = vld [vmem:[#allocation5 + $0xd0] sm:$0xff]   ;;  %v183_v30 = vshrl.u32 %v182_v24, 7  ;;  %vm1210_vm2 = vmmov 0   ;;  %s1211_s28 = smov [#allocation8]  }
  0x39   :  { %v1045_v3 = vld [vmem:[#allocation5 + $0x80] sm:$0xff]   ;;  %938 = vmatpush3.bf16.msra.mxu0 %v1044_v2  ;;  %v1049_v7 = vld [vmem:[#allocation5 + $0x88] sm:$0xff]   ;;  %v1052_v10 = vld [vmem:[#allocation5 + $0x10] sm:$0xff]   ;;  %v181_v29 = vunpack.c.0.s8 %v180_v23  ;;  %s859_s29 = sshll.u32 %s1211_s28, 4  ;;  %s860_s29 = int_to_ptr.vmem [resolvable:$true] %s859_s29 }
  0x3a   :  { %960 = vmatpush3.bf16.msra.mxu1 %v1045_v3  ;;  %939 = vmatprep.subr.bf16.mxu0 %v1046_v4  ;;  %v1053_v11 = vld [vmem:[#allocation5 + $0x90] sm:$0xff]   ;;  %v1054_v12 = vld [vmem:[#allocation5 + $0x58] sm:$0xff]   ;;  %v1058_v16 = vld [vmem:[#allocation5 + $0x60] sm:$0xff]   ;;  %s1174_s30 = scalar_lea.vmem %s860_s29, 32  ;;  %p1179_p11 = scmp.lt.s32.totalorder %s860_s29, %s860_s29 }
  0x3b   :  { %961 = vmatprep.subr.bf16.mxu1 %v1047_v5  ;;  %v1055_v13 = vld [vmem:[#allocation5 + $0xd8] sm:$0xff]   ;;  %v1059_v17 = vld [vmem:[#allocation5 + $0xe0] sm:$0xff]   ;;  %v1062_v20 = vld [vmem:[#allocation5 + $0x68] sm:$0xff]   ;;  %v1279_v35 = vsub.s32 %v181_v29, %v183_v30  ;;  %p1175_p10 = scmp.ne.s32.totalorder %s860_s29, %s1174_s30  ;;  %p1180_p12 = scmp.lt.s32.totalorder %s1174_s30, %s1174_s30 }
  0x3c   :  { %v1056_v14 = vld [vmem:[#allocation5 + $0x18] sm:$0xff]   ;;  %v1060_v18 = vld [vmem:[#allocation5 + $0x20] sm:$0xff]   ;;  %v1063_v21 = vld [vmem:[#allocation5 + $0xe8] sm:$0xff]  }
  0x3d   :  { %940 = vmatpush3.bf16.msra.mxu0 %v1048_v6  ;;  %v1057_v15 = vld [vmem:[#allocation5 + $0x98] sm:$0xff]   ;;  %v1061_v19 = vld [vmem:[#allocation5 + $0xa0] sm:$0xff]   ;;  %v1064_v25 = vld [vmem:[#allocation5 + $0x28] sm:$0xff]   ;;  %p1181_p13 = por %p1180_p12, %p1179_p11 }
  0x3e   :  { %962 = vmatpush3.bf16.msra.mxu1 %v1049_v7  ;;  %941 = vmatprep.subr.bf16.mxu0 %v1050_v8  ;;  %v1065_v26 = vld [vmem:[#allocation5 + $0xa8] sm:$0xff]   ;;  %v1066_v27 = vld [vmem:[#allocation5 + $0x70] sm:$0xff]   ;;  %v1070_v33 = vld [vmem:[#allocation5 + $0x78] sm:$0xff]  }
  0x3f   :  { %963 = vmatprep.subr.bf16.mxu1 %v1051_v9  ;;  %v1067_v28 = vld [vmem:[#allocation5 + $0xf0] sm:$0xff]   ;;  %v1071_v34 = vld [vmem:[#allocation5 + $0xf8] sm:$0xff]   ;;  %v1075_v41 = vld [vmem:[#allocation5 + $0x140] sm:$0xff]   ;;  %p1182_p0 = pnand %p1181_p13, %p1175_p10 }
  0x40   :  { %v1068_v31 = vld [vmem:[#allocation5 + $0x30] sm:$0xff]   ;;  %v1072_v36 = vld [vmem:[#allocation5 + $0x38] sm:$0xff]   ;;  %v1076_v47 = vld [vmem:[#allocation5 + $0x100] sm:$0xff]  }
  0x41   :  { %942 = vmatpush3.bf16.msra.mxu0 %v1052_v10  ;;  %v1069_v32 = vld [vmem:[#allocation5 + $0xb0] sm:$0xff]   ;;  %v1073_v37 = vld [vmem:[#allocation5 + $0xb8] sm:$0xff]   ;;  %v1078_v50 = vld [vmem:[#allocation5 + $0x148] sm:$0xff]  }
  0x42   :  { %964 = vmatpush3.bf16.msra.mxu1 %v1053_v11  ;;  %943 = vmatprep.subr.bf16.mxu0 %v1054_v12  ;;  %v58_v38 = vld [vmem:[#allocation2] sm:$0xff]  ;;  %v1077_v52 = vld [vmem:[#allocation5 + $0x180] sm:$0xff]   ;;  %v1079_v54 = vld [vmem:[#allocation5 + $0x108] sm:$0xff]  }
  0x43   :  { %965 = vmatprep.subr.bf16.mxu1 %v1055_v13  ;;  %v178_v39 = vcombine.high %v58_v38, %v58_v38  ;;  %v185_v40 = vrot.slane %v58_v38, %v1279_v35  ;;  %v1081_v56 = vld [vmem:[#allocation5 + $0x150] sm:$0xff]   ;;  %v1080_v57 = vld [vmem:[#allocation5 + $0x188] sm:$0xff]   ;;  %v1084_v59 = vld [vmem:[#allocation5 + $0x158] sm:$0xff]  }
  0x44   :  { %v1082_v58 = vld [vmem:[#allocation5 + $0x110] sm:$0xff]   ;;  %v1085_v61 = vld [vmem:[#allocation5 + $0x118] sm:$0xff]   ;;  %v1087_v62 = vld [vmem:[#allocation5 + $0x160] sm:$0xff]  }
  0x45   :  { %944 = vmatpush3.bf16.msra.mxu0 %v1056_v14  ;;  %v193_v43 = vcombine.high %v185_v40, %v185_v40  ;;  %v201_v44 = vrot.slane %v185_v40, %v1279_v35  ;;  %v1285_v45 = vrot.slane %v178_v39, %v1279_v35  ;;  %v1083_v60 = vld [vmem:[#allocation5 + $0x190] sm:$0xff]   ;;  %v1086_v63 = vld [vmem:[#allocation5 + $0x198] sm:$0xff]   ;;  %v1088_v0 = vld [vmem:[#allocation5 + $0x120] sm:$0xff]  }
  0x46   :  { %966 = vmatpush3.bf16.msra.mxu1 %v1057_v15  ;;  %945 = vmatprep.subr.bf16.mxu0 %v1058_v16  ;;  %v1090_v1 = vld [vmem:[#allocation5 + $0x168] sm:$0xff]   ;;  %v1089_v2 = vld [vmem:[#allocation5 + $0x1a0] sm:$0xff]   ;;  %v1093_v5 = vld [vmem:[#allocation5 + $0x170] sm:$0xff]   ;;  %v1209_v16 = vmov 0.0  }
  0x47   :  { %967 = vmatprep.subr.bf16.mxu1 %v1059_v17  ;;  %v215_v46 = vrot.slane %v193_v43, %v1279_v35  ;;  %v194_v48 = vcombine.high %v1285_v45, %v1285_v45  ;;  %v223_v49 = vcombine.high %v201_v44, %v201_v44  ;;  %v1091_v3 = vld [vmem:[#allocation5 + $0x128] sm:$0xff]   ;;  %v1094_v6 = vld [vmem:[#allocation5 + $0x130] sm:$0xff]   ;;  %v1096_v7 = vld [vmem:[#allocation5 + $0x178] sm:$0xff]   ;;  %v208_v11 = vrot.slane %v1285_v45, %v1279_v35 }
  0x48   :  { %v1092_v4 = vld [vmem:[#allocation5 + $0x1a8] sm:$0xff]   ;;  %v1095_v8 = vld [vmem:[#allocation5 + $0x1b0] sm:$0xff]   ;;  %v1097_v9 = vld [vmem:[#allocation5 + $0x138] sm:$0xff]  }
  0x49   :  { %946 = vmatpush3.bf16.msra.mxu0 %v1060_v18  ;;  %613 = vmatprep.mubr.bf16.mxu0 %v215_v46  ;;  %v225_v51 = vcombine.high %v215_v46, %v215_v46  ;;  %v222_v53 = vrot.slane %v194_v48, %v1279_v35  ;;  %v1098_v10 = vld [vmem:[#allocation5 + $0x1b8] sm:$0xff]   ;;  %v1099_v12 = vld [vmem:[#allocation5 + $0x1c0] ss:$0 sps:$4 sm:$0x33]   ;;  %v224_v14 = vcombine.high %v208_v11, %v208_v11  ;;  %v1100_v15 = vld [vmem:[#allocation7] sm:$0xff]  }
  0x4a   :  { %968 = vmatpush3.bf16.msra.mxu1 %v1061_v19  ;;  %947 = vmatprep.subr.bf16.mxu0 %v1062_v20  ;;  %v579_v13 = vsel %vm577_vm1, %v1099_v12, 0  ;;  %v1101_v17 = vld [vmem:[#allocation7 + $0x8] sm:$0xff]   ;;  %v1102_v18 = vld [vmem:[#allocation7 + $0x10] sm:$0xff]   ;;  %v1103_v19 = vld [vmem:[#allocation7 + $0x18] sm:$0xff]  }
  0x4b   :  { %969 = vmatprep.subr.bf16.mxu1 %v1063_v21  ;;  %653 = vmatprep.mubr.bf16.mxu1 %v225_v51  ;;  %v226_v55 = vcombine.high %v222_v53, %v222_v53  ;;  %v1104_v20 = vld [vmem:[#allocation7 + $0x20] sm:$0xff]   ;;  %v1105_v21 = vld [vmem:[#allocation7 + $0x28] sm:$0xff]   ;;  %v1106_v22 = vld [vmem:[#allocation7 + $0x30] sm:$0xff]  }
  0x4c   :  { %v1107_v23 = vld [vmem:[#allocation7 + $0x38] sm:$0xff]  }
  0x4d   :  { %948 = vmatpush3.bf16.msra.mxu0 %v1064_v25  ;;  %v869_v25 = vld [vmem:[%s1322_s3] ss:$0 sm:$0xff] }
  0x4e   :  { %970 = vmatpush3.bf16.msra.mxu1 %v1065_v26  ;;  %949 = vmatprep.subr.bf16.mxu0 %v1066_v27 }
  0x4f   :  { %971 = vmatprep.subr.bf16.mxu1 %v1067_v28 }
  0x51   :  { %950 = vmatpush3.bf16.msra.mxu0 %v1068_v31 }
  0x52   :  { %972 = vmatpush3.bf16.msra.mxu1 %v1069_v32  ;;  %951 = vmatprep.subr.bf16.mxu0 %v1070_v33 }
  0x53   :  { %973 = vmatprep.subr.bf16.mxu1 %v1071_v34 }
  0x55   :  { %952 = vmatpush3.bf16.msra.mxu0 %v1072_v36 }
  0x56   :  { %974 = vmatpush3.bf16.msra.mxu1 %v1073_v37  ;;  %981 = vmatprep.subr.bf16.mxu0 %v1075_v41 }
  0x57   :  { %701 = vmatprep.subr.bf16.mxu1 %v1208_v42 }
  0x58   :  { %614 = vmatmul.mubr.bf16.vlgmr.msra.gmra.mrb[0].mxu0 %v201_v44 }
  0x59   :  { %982 = vmatpush3.bf16.msra.mxu0 %v1076_v47  ;;  %654 = vmatmul.mubr.bf16.vlgmr.msra.gmra.mrb[0].mxu1 %v223_v49 }
  0x5a   :  { %983 = vmatprep.subr.bf16.mxu0 %v1078_v50  ;;  %702 = vmatpush1.bf16.msra.mxu1 %v1077_v52  ;;  %v928_v50 = vld [vmem:[%s1322_s3 + $0x1] ss:$0 sm:$0xff] }
  0x5b   :  { %693 = vmatprep.mubr.bf16.mxu0 %v222_v53  ;;  %703 = vmatprep.subr.bf16.mxu1 %v1208_v42 }
  0x5c   :  { %927 = vmatprep.mubr.msk.bf16.mxu1 %vm573_vm0, %v226_v55 }
  0x5d   :  { %984 = vmatpush3.bf16.msra.mxu0 %v1079_v54 }
  0x5e   :  { %985 = vmatprep.subr.bf16.mxu0 %v1081_v56  ;;  %704 = vmatpush1.bf16.msra.mxu1 %v1080_v57 }
  0x5f   :  { %705 = vmatprep.subr.bf16.mxu1 %v1208_v42 }
  0x61   :  { %986 = vmatpush3.bf16.msra.mxu0 %v1082_v58 }
  0x62   :  { %987 = vmatprep.subr.bf16.mxu0 %v1084_v59  ;;  %706 = vmatpush1.bf16.msra.mxu1 %v1083_v60 }
  0x63   :  { %707 = vmatprep.subr.bf16.mxu1 %v1208_v42 }
  0x65   :  { %988 = vmatpush3.bf16.msra.mxu0 %v1085_v61 }
  0x66   :  { %989 = vmatprep.subr.bf16.mxu0 %v1087_v62  ;;  %708 = vmatpush1.bf16.msra.mxu1 %v1086_v63 }
  0x67   :  { %709 = vmatprep.subr.bf16.mxu1 %v1208_v42 }
  0x69   :  { %990 = vmatpush3.bf16.msra.mxu0 %v1088_v0 }
  0x6a   :  { %991 = vmatprep.subr.bf16.mxu0 %v1090_v1  ;;  %710 = vmatpush1.bf16.msra.mxu1 %v1089_v2 }
  0x6b   :  { %711 = vmatprep.subr.bf16.mxu1 %v1208_v42 }
  0x6d   :  { %992 = vmatpush3.bf16.msra.mxu0 %v1091_v3 }
  0x6e   :  { %993 = vmatprep.subr.bf16.mxu0 %v1093_v5  ;;  %712 = vmatpush1.bf16.msra.mxu1 %v1092_v4 }
  0x6f   :  { %713 = vmatprep.subr.bf16.mxu1 %v1208_v42 }
  0x71   :  { %994 = vmatpush3.bf16.msra.mxu0 %v1094_v6 }
  0x72   :  { %995 = vmatprep.subr.bf16.mxu0 %v1096_v7  ;;  %714 = vmatpush1.bf16.msra.mxu1 %v1095_v8 }
  0x73   :  { %715 = vmatprep.subr.bf16.mxu1 %v1208_v42 }
  0x75   :  { %996 = vmatpush3.bf16.msra.mxu0 %v1097_v9 }
  0x76   :  { %716 = vmatpush1.bf16.msra.mxu1 %v1098_v10  ;;  %1012 = vmatprep.subr.bf16.mxu0 %v1209_v16 }
  0x77   :  { %717 = vmatprep.subr.bf16.mxu1 %v1208_v42 }
  0x78   :  { %694 = vmatmul.mubr.bf16.vlgmr.msra.gmra.mrb[4].mxu0 %v208_v11 }
  0x79   :  { %1013 = vmatpush3.bf16.msra.mxu0 %v1100_v15  ;;  %1028 = vmatprep.mubr.msk.bf16.mxu0 %vm1210_vm2, %v1209_v16 }
  0x7a   :  { %718 = vmatpush1.bf16.msra.mxu1 %v579_v13  ;;  %1014 = vmatprep.subr.bf16.mxu0 %v1209_v16 }
  0x7d   :  { %734 = vmatmul.mubr.bf16.vlgmr.msra.gmra.mrb[4].mxu1 %v224_v14  ;;  %1015 = vmatpush3.bf16.msra.mxu0 %v1101_v17 }
  0x7e   :  { %1016 = vmatprep.subr.bf16.mxu0 %v1209_v16 }
  0x81   :  { %1017 = vmatpush3.bf16.msra.mxu0 %v1102_v18 }
  0x82   :  { %1018 = vmatprep.subr.bf16.mxu0 %v1209_v16 }
  0x85   :  { %1019 = vmatpush3.bf16.msra.mxu0 %v1103_v19 }
  0x86   :  { %1020 = vmatprep.subr.bf16.mxu0 %v1209_v16 }
  0x89   :  { %1021 = vmatpush3.bf16.msra.mxu0 %v1104_v20 }
  0x8a   :  { %1022 = vmatprep.subr.bf16.mxu0 %v1209_v16 }
  0x8d   :  { %1023 = vmatpush3.bf16.msra.mxu0 %v1105_v21 }
  0x8e   :  { %1024 = vmatprep.subr.bf16.mxu0 %v1209_v16 }
  0x91   :  { %1025 = vmatpush3.bf16.msra.mxu0 %v1106_v22 }
  0x92   :  { %1026 = vmatprep.subr.bf16.mxu0 %v1209_v16 }
  0x95   :  { %1027 = vmatpush3.bf16.msra.mxu0 %v1107_v23 }
 0x12b   :  { %v953_v24 = vpop.f32.mrb[0].mxu0 }
 0x12c   :  { %v954_v26 = vpop.f32.mrb[1].mxu0  ;;  %v975_v27 = vpop.f32.mrb[0].mxu1 }
 0x12d   :  { %v955_v28 = vadd.f32 %v954_v26, %v953_v24  ;;  %v956_v29 = vpop.f32.mrb[2].mxu0  ;;  %v976_v30 = vpop.f32.mrb[1].mxu1 }
 0x12e   :  { %v957_v31 = vpop.f32.mrb[3].mxu0  ;;  %v977_v33 = vadd.f32 %v976_v30, %v975_v27  ;;  %v978_v34 = vpop.f32.mrb[2].mxu1 }
 0x12f   :  { %v616_v32 = vadd.f32 %v955_v28, %v869_v25  ;;  %v979_v35 = vpop.f32.mrb[3].mxu1 }
 0x131   :  { %v656_v36 = vadd.f32 %v977_v33, %v616_v32 }
 0x14b   :  { %v997_v37 = vpop.f32.mrb[4].mxu0 }
 0x14c   :  { %v998_v38 = vpop.f32.mrb[5].mxu0 }
 0x14d   :  { %v999_v39 = vadd.f32 %v998_v38, %v997_v37  ;;  %v1000_v40 = vpop.f32.mrb[6].mxu0 }
 0x14e   :  { %v1001_v41 = vpop.f32.mrb[7].mxu0 }
 0x14f   :  { %v696_v42 = vadd.f32 %v999_v39, %v656_v36 }
 0x150   :  { %v735_v43 = vpop.f32.mrb[4].mxu1 }
 0x151   :  { %v736_v44 = vadd.f32 %v735_v43, %v696_v42  ;;  %v737_v45 = vpop.f32.mrb[5].mxu1 }
 0x152   :  { %v738_v46 = vpop.f32.mrb[6].mxu1 }
 0x153   :  { %v741_v47 = vmax.f32 %v736_v44, 0.0  ;;  %v739_v48 = vpop.f32.mrb[7].mxu1 }
 0x155   :  { %v742_v49 = vpack.c.bf16 %v741_v47, %v741_v47 }
 0x157   :  { %1029 = vmatmul.mubr.bf16.vlgmr.msra.gmra.mrb[8].mxu0 %v742_v49 }
 0x22a   :  { %v846_v51 = vpop.f32.mrb[8].mxu0 }
 0x22b   :  { %v847_v52 = vadd.f32 %v928_v50, %v846_v51  ;;  %v1030_v53 = vpop.f32.mrb[9].mxu0 }
 0x22c   :  { %v849_v54 = vpop.f32.mrb[10].mxu0 }
 0x22d   :  { %852 = vst [vmem:[#allocation8] sm:$0x3] %v847_v52  ;;  %v1031_v55 = vpop.f32.mrb[11].mxu0 }
 0x22e   :  { %1185 = shalt.err (!%p1182_p0)
}
 0x22f   :  { %s1186_s3 = scalar_lea.hbm %s1323_s4, 32 }
 0x230   :  { %p1187_p1 = scmp.ne.s32.totalorder %s1323_s4, %s1186_s3  ;;  %p1190_p2 = scmp.lt.u32.totalorder %s1186_s3, %s1323_s4 }
 0x232   :  { %p1192_p3 = pnand %p1190_p2, %p1187_p1 }
 0x234   :  { %1195 = shalt.err (!%p1192_p3)
}
 0x235   :  { %862 = dma.vmem_to_hbm [thread:$0]  %s860_s29, 32, %s1323_s4, [#allocation4]  }
 0x236   :  { %1200 = dma.done.wait [#allocation4], 32  }
 0x237   :  { %1201 = vsyncadd [#allocation4], 4294967264 }
 0x238   :  { %866 = vsyncpa [#allocation3], 1 }
 0x239   :  { %867 = vsyncpa [#allocation6], 1 }
 0x23a   :  { %868 = vsyncpa [#allocation4], 1 }

</bundles_post_ra>
